<compile_context>
chip_gen: v5e
topology: v5e:2x2
jax: 0.10.0
libtpu: 0.0.40
codegen_flags: <defaults>
</compile_context>

<pallas_src>
import functools

import jax
import jax.numpy as jnp
from jax.experimental import pallas as pl
from jax.experimental.pallas import tpu as pltpu


def _conv1x1_kernel(w_ref, x_ref, o_ref):
    # w_ref: (Cout, Cin) resident weight, x_ref: (Cin, tm) lane-dense pixel tile,
    # o_ref: (Cout, tm) lane-dense output tile. Channel contraction on the MXU, f32 accumulate.
    o_ref[...] = jnp.dot(
        w_ref[...], x_ref[...], preferred_element_type=jnp.float32
    ).astype(o_ref.dtype)


@functools.partial(jax.jit, static_argnames=("tm",))
def conv1x1(x, weight, *, tm=2048):
    """x: (N, Cin, H, W) float32, NCHW.  weight: (Cout, Cin) (1x1 conv kernel squeezed)."""
    n, cin, h, w = x.shape
    cout = weight.shape[0]
    m = h * w

    # NCHW already has spatial dims last: merging H,W is free (no data movement).
    x_flat = x.reshape(n, cin, m)

    # Clamp the pixel tile to the (128-rounded) spatial extent; pad M so any real
    # LPIPS shape works without forcing tm down to a small divisor.
    tm = min(tm, ((m + 127) // 128) * 128)
    m_pad = ((m + tm - 1) // tm) * tm
    if m_pad != m:
        x_flat = jnp.pad(x_flat, ((0, 0), (0, 0), (0, m_pad - m)))

    grid = (n, m_pad // tm)

    cost = pl.CostEstimate(
        flops=2 * n * m_pad * cin * cout,
        transcendentals=0,
        bytes_accessed=4 * (n * m_pad * cin + n * m_pad * cout + cin * cout),
    )

    out = pl.pallas_call(
        _conv1x1_kernel,
        out_shape=jax.ShapeDtypeStruct((n, cout, m_pad), x.dtype),
        grid_spec=pltpu.PrefetchScalarGridSpec(
            num_scalar_prefetch=0,
            grid=grid,
            in_specs=[
                # Tiny weight (<= 1x512 for LPIPS); constant block index keeps it resident.
                pl.BlockSpec((cout, cin), lambda b, i: (0, 0)),
                # (Cin, tm): tm (multiple of 128) on lanes -> fully dense vector loads.
                pl.BlockSpec((None, cin, tm), lambda b, i: (b, 0, i)),
            ],
            out_specs=pl.BlockSpec((None, cout, tm), lambda b, i: (b, 0, i)),
        ),
        compiler_params=pltpu.CompilerParams(
            dimension_semantics=("parallel", "parallel"),
        ),
        cost_estimate=cost,
    )(weight, x_flat)

    if m_pad != m:
        out = out[:, :, :m]
    return out.reshape(n, cout, h, w)


if __name__ == "__main__":
    key = jax.random.PRNGKey(0)
    kx, kw = jax.random.split(key)

    N, CIN, H, W = 2, 4, 16, 16
    COUT = 1  # Conv1x1 default out_channels=1

    x = jax.random.normal(kx, (N, CIN, H, W), dtype=jnp.float32)
    # Conv2d weight shape is (Cout, Cin, 1, 1); we keep the squeezed (Cout, Cin) form.
    weight = jax.random.normal(kw, (COUT, CIN), dtype=jnp.float32) * 0.1

    y = conv1x1(x, weight)
    y = jax.block_until_ready(y)

    # Correctness check against a plain-JAX reference of the 1x1 conv (eval-mode Dropout = identity).
    y_ref = jnp.einsum("nchw,oc->nohw", x, weight)
    assert y.shape == (N, COUT, H, W), y.shape
    assert jnp.allclose(y, y_ref, atol=1e-5, rtol=1e-5), "mismatch vs reference"

    print("KERNEL_OK")
</pallas_src>

<mosaic_0001>
module attributes {stable_mosaic.version = 11 : i64} {
  func.func @_conv1x1_kernel(%arg0: i32, %arg1: i32, %arg2: memref<1x4xf32, #tpu.memory_space<vmem>>, %arg3: memref<1x4x256xf32, #tpu.memory_space<vmem>>, %arg4: memref<1x1x256xf32, #tpu.memory_space<vmem>>) attributes {dimension_semantics = [#tpu.dimension_semantics<parallel>, #tpu.dimension_semantics<parallel>], iteration_bounds = array<i64: 2, 1>, scalar_prefetch = 0 : i64, scratch_operands = 0 : i64, tpu.core_type = #tpu.core_type<tc>, window_params = [{pipeline_mode = #tpu.pipeline_mode<synchronous>, transform_indices = @transform_0, window_bounds = array<i64: 1, 4>}, {transform_indices = @transform_1, window_bounds = array<i64: 1, 4, 256>}, {transform_indices = @transform_2, window_bounds = array<i64: 1, 1, 256>}]} {
    %c0 = arith.constant 0 : index
    %c0_0 = arith.constant 0 : index
    %0 = vector.load %arg2[%c0, %c0_0] : memref<1x4xf32, #tpu.memory_space<vmem>>, vector<1x4xf32>
    %c0_1 = arith.constant 0 : index
    %c0_2 = arith.constant 0 : index
    %c0_3 = arith.constant 0 : index
    %1 = vector.load %arg3[%c0_1, %c0_2, %c0_3] : memref<1x4x256xf32, #tpu.memory_space<vmem>>, vector<1x4x256xf32>
    %2 = vector.shape_cast %1 : vector<1x4x256xf32> to vector<4x256xf32>
    %cst = arith.constant dense<0.000000e+00> : vector<1x256xf32>
    %3 = tpu.matmul %0, %2, %cst {dimension_numbers = #tpu.dot_dimension_numbers<[1], [0], [0], [1], [0, 0, 1, 1], [], []>} : vector<1x4xf32>, vector<4x256xf32>, vector<1x256xf32> -> vector<1x256xf32>
    %c0_4 = arith.constant 0 : index
    %c0_5 = arith.constant 0 : index
    %c0_6 = arith.constant 0 : index
    %4 = vector.load %arg4[%c0_4, %c0_5, %c0_6] : memref<1x1x256xf32, #tpu.memory_space<vmem>>, vector<1x1x256xf32>
    %5 = vector.shape_cast %4 : vector<1x1x256xf32> to vector<1x256xf32>
    %6 = vector.shape_cast %3 : vector<1x256xf32> to vector<1x1x256xf32>
    tpu.vector_store %arg4[%c0_4, %c0_5, %c0_6], %6 {strides = array<i32>} : memref<1x1x256xf32, #tpu.memory_space<vmem>>, vector<1x1x256xf32>,
    return
  }
  func.func @transform_0(%arg0: i32, %arg1: i32) -> (i32, i32) {
    %c0_i32 = arith.constant 0 : i32
    %c0_i32_0 = arith.constant 0 : i32
    %c0_i32_1 = arith.constant 0 : i32
    return %c0_i32, %c0_i32_0 : i32, i32
  }
  func.func @transform_1(%arg0: i32, %arg1: i32) -> (i32, i32, i32) {
    %c0_i32 = arith.constant 0 : i32
    %c0_i32_0 = arith.constant 0 : i32
    return %arg0, %c0_i32, %arg1 : i32, i32, i32
  }
  func.func @transform_2(%arg0: i32, %arg1: i32) -> (i32, i32, i32) {
    %c0_i32 = arith.constant 0 : i32
    %c0_i32_0 = arith.constant 0 : i32
    return %arg0, %c0_i32, %arg1 : i32, i32, i32
  }
}

</mosaic_0001>

<bundles_post_ra>
// kernel: conv1x1.1
= control target key start
LH: loop header
LB: loop body
LE: loop exit
PB: predicated region body
PF: predicated region fallthrough
CT: control target
= control target key end

     0   :  { %s406_s9 = smov 0   ;;  %s408_s10 = smov 0   ;;  %s442_s0 = inlined_call_operand.vmem [shape: f32[1,4], index: 0, kind: input, shape index: {}]   ;;  %s443_s1 = inlined_call_operand.vmem [shape: f32[2,4,256], index: 1, kind: input, shape index: {}]   ;;  %s444_s2 = inlined_call_operand.vmem [shape: f32[2,1,256], index: 2, kind: output, shape index: {}]  }
   0x1   :  { %s410_s11 = smov 0  }
   0x2 LB: > { %s24_s12 = sadd.s32 1, %s385_s10  ;;  %p332_p0 = scmp.ge.s32.totalorder %s389_s11, 1  ;;  %s389_s11 = sphi %s410_s11, %s12_s11   ;;  %s385_s10 = sphi %s408_s10, %s446_s10   ;;  %s381_s9 = sphi %s406_s9, %s445_s9  }
   0x3   : > { %p26_p1 = scmp.ge.s32.totalorder %s24_s12, 2  ;;  %p133_p2 = scmp.lt.s32.totalorder %s389_s11, 3 }
   0x5   : > { %s448_s12 = smov (%p26_p1, %s24_s12), 0  ;;  %p134_p3 = pnand %p332_p0, %p133_p2 }
   0x6   : > { %p163_p4 = scmp.lt.s32.totalorder (!%p134_p3), %s381_s9, 1 }
   0x7   : > { %137 = sbr.rel (%p134_p3) target bundleno = 155 (0x9b), region = 28 }
   0xc   : > { %s450_s9 = smov (!%p163_p4, %s381_s9), 1  ;;  %vm191_vm0 = vcmask 1043456   ;;  %v181_v1 = vld [vmem:[%s442_s0] sm:$0x1]  ;;  %vm187_vm1 = vcmask 31744   ;;  %v242_v4 = vlaneseq  ;;  %vm239_vm2 = vcmask 1040384  }
   0xd   : > { %s342_s13 = sshll.u32 %s450_s9, 3  ;;  %s335_s19 = sshll.u32 %s450_s9, 1 }
   0xe   : > { %s170_s16 = scalar_lea.vmem %s443_s1, %s342_s13  ;;  %s179_s22 = scalar_lea.vmem %s444_s2, %s335_s19  ;;  %vm244_vm3 = vcmp.lt.s32.totalorder %v242_v4, 256 }
   0xf   : > { %v182_v0 = vld [vmem:[%s170_s16] sm:$0xff] }
  0x10   : > { %184 = vst [vmem:[#allocation1] ss:$2 sm:$0xff] %v182_v0 }
  0x17   : > { %v186_v2 = vld.sshfl [vmem:[#allocation1 + $0x8] sm:$0xff pattern:$0x75316420]  ;;  %v185_v3 = vld.sshfl [vmem:[#allocation1] sm:$0xff pattern:$0x75316420] }
  0x18   : > { %338 = vmatpush.msk.msra.mxu1 %vm191_vm0, %v186_v2  ;;  %336 = vmatpush.msk.msra.mxu0 %vm191_vm0, %v185_v3 }
  0x19   : > { %339 = vmatmul.msk.f32.vlgmr.msra.gmra.mxu1 %vm187_vm1, %v181_v1  ;;  %337 = vmatmul.msk.f32.vlgmr.msra.gmra.mxu0 %vm187_vm1, %v181_v1 }
  0x96   : > { %v233_v5 = vpop.f32.mrf.mxu1  ;;  %v213_v6 = vpop.f32.mrf.mxu0 }
  0x97   : > { %v238_v7 = vrot.slane %v233_v5, 7 }
  0x99   : > { %v240_v8 = vsel %vm239_vm2, %v213_v6, %v238_v7 }
  0x9a   : > { %246 = vst.msk [vmem:[%s179_s22] sm:$0x3] %vm244_vm3, %v240_v8 }
  0x9b PF: > { %s12_s11 = sadd.s32 1, %s389_s11   ;;  %s445_s9 = smov %s385_s10 }
  0x9c   : > { %p9_p5 = scmp.ge.s32.totalorder %s12_s11, 4   ;;  %s446_s10 = smov %s448_s12 }
  0x9e   :  { %11 = sbr.rel (!%p9_p5) target bundleno = 2 (0x2), region = 58 }

</bundles_post_ra>
